<compile_context>
chip_gen: v7x
topology: tpu7x:2x2x1
jax: 0.10.0
libtpu: 0.0.40
codegen_flags: <defaults>
</compile_context>

<pallas_src>
import jax
import jax.numpy as jnp
from jax.experimental import pallas as pl
from jax.experimental.pallas import tpu as pltpu

# ----------------------------- model config ---------------------------------
BATCH = 256            # batched so the kernel is not pure per-call overhead
TILE_B = 256           # full batch in one grid step (single-TC: grid = overhead)
INPUT_DIM = 4          # must be even (split into q / p halves)
HIDDEN = (32, 32)      # model_args.hidden_dim
OUTPUT_DIM = 1         # HNN forces output_dim = 1


# ------------------------------- kernel -------------------------------------
def hnn_kernel(xT_ref,
               w0f_ref, b0_ref,
               w1f_ref, b1_ref,
               w2r_ref, w2c_ref, b2_ref,
               w1b_ref, w0s_ref,
               out_ref):
    """Batch-on-lanes layout: every activation is [features, batch_tile].

       out_ref[:D, :] = Xdot_hat^T = [dH/dp, -dH/dq]^T
       out_ref[D,  :] = H_hat^T
    """
    xT = xT_ref[...]                                             # [D, tb]

    # ---------------- forward: H_hat = MLP(x) ----------------
    z0 = jnp.dot(w0f_ref[...], xT,
                 preferred_element_type=jnp.float32) + b0_ref[...]   # [h0, tb]
    e0 = jnp.exp(z0)                                             # shared ELU / ELU'
    a0 = jnp.where(z0 > 0, z0, e0 - 1.0)                         # ELU(alpha=1)

    z1 = jnp.dot(w1f_ref[...], a0,
                 preferred_element_type=jnp.float32) + b1_ref[...]   # [h1, tb]
    e1 = jnp.exp(z1)
    a1 = jnp.where(z1 > 0, z1, e1 - 1.0)                         # ELU(alpha=1)

    # [1, h1] @ [h1, tb] on the MXU (replaces the old cross-lane reduction)
    h = jnp.dot(w2r_ref[...], a1,
                preferred_element_type=jnp.float32) + b2_ref[...]    # [1, tb]

    # ---------------- backward: grad of H.sum() w.r.t. x ----------------
    d1 = jnp.where(z1 > 0, 1.0, e1)                              # ELU'(z1), reuses e1
    g1 = w2c_ref[...] * d1                                       # [h1, tb] (column bcast)
    g0 = jnp.dot(w1b_ref[...], g1,
                 preferred_element_type=jnp.float32)             # [h0, tb]
    d0 = jnp.where(z0 > 0, 1.0, e0)                              # ELU'(z0), reuses e0
    # w0s has the symplectic matrix folded in, so this matmul directly yields
    # Xdot^T = [dH/dp, -dH/dq]^T -- no concatenate / roll of activations.
    xdot = jnp.dot(w0s_ref[...], g0 * d0,
                   preferred_element_type=jnp.float32)           # [D, tb]

    # single lane-dense store of the whole [D+1, tb] output block
    out_ref[...] = jnp.concatenate([xdot, h], axis=0)


# ------------------------------- wrapper -------------------------------------
def hnn_forward(x, params, tile_b=TILE_B):
    w0, b0, w1, b1, w2, b2 = params          # stored as [in, out] / [1, out]
    B, D = x.shape
    half = D // 2
    h0 = w0.shape[1]
    h1 = w1.shape[1]

    # ---- one-time wrapper-side re-layouts (tiny arrays, no in-kernel work) ----
    xT = x.T                                  # [D, B]   batch on the lane axis
    w0f = w0.T                                # [h0, D]  forward layer 0
    b0c = b0.reshape(h0, 1)                   # column bias (lane broadcast)
    w1f = w1.T                                # [h1, h0] forward layer 1
    b1c = b1.reshape(h1, 1)
    w2r = w2.T                                # [1, h1]  forward output row
    w2c = w2                                  # [h1, 1]  backward seed column
    b2c = b2.reshape(1, 1)
    w1b = w1                                  # [h0, h1] = (W1 forward)^T
    # Fold the symplectic matrix S = [[0, I], [-I, 0]] into the last backward
    # weight:  Xdot^T = [grad^T[half:], -grad^T[:half]] = w0s @ (g0 * d0)
    w0s = jnp.concatenate([w0[half:, :], -w0[:half, :]], axis=0)   # [D, h0]

    tile_b = min(tile_b, B)
    assert B % tile_b == 0, "batch must be a multiple of the batch tile"
    assert tile_b % 128 == 0 or tile_b == B, "tile must be lane-aligned"
    grid = (B // tile_b,)

    def resident(arr):
        # constant index map -> block stays VMEM-resident across the batch grid
        return pl.BlockSpec(arr.shape, lambda i: (0,) * arr.ndim)

    # advisory cost hint: this kernel is launch/DMA-latency bound, tell XLA so
    flops = 2 * B * (h0 * D + h1 * h0 + h1 + h0 * h1 + D * h0)
    transc = 2 * h1 * B
    bytes_acc = 4 * (D * B + (D + 1) * B
                     + w0f.size + b0c.size + w1f.size + b1c.size
                     + w2r.size + w2c.size + b2c.size + w1b.size + w0s.size)

    out = pl.pallas_call(
        hnn_kernel,
        grid=grid,
        in_specs=[
            pl.BlockSpec((D, tile_b), lambda i: (0, i)),     # x^T: tiled over lanes
            resident(w0f), resident(b0c),
            resident(w1f), resident(b1c),
            resident(w2r), resident(w2c), resident(b2c),
            resident(w1b), resident(w0s),
        ],
        out_specs=pl.BlockSpec((D + 1, tile_b), lambda i: (0, i)),
        out_shape=jax.ShapeDtypeStruct((D + 1, B), jnp.float32),
        compiler_params=pltpu.CompilerParams(
            dimension_semantics=("parallel",)),              # megacore split on v7x
        cost_estimate=pl.CostEstimate(flops=flops, transcendentals=transc,
                                      bytes_accessed=bytes_acc),
    )(xT, w0f, b0c, w1f, b1c, w2r, w2c, b2c, w1b, w0s)

    return {'xdot_hat': out[:D, :].T, 'H_hat': out[D:, :].T}


# ------------------------- deterministic init --------------------------------
def init_params(key):
    dims = (INPUT_DIM,) + HIDDEN + (OUTPUT_DIM,)
    params = []
    for i in range(len(dims) - 1):
        key, kw, kb = jax.random.split(key, 3)
        fan_in = dims[i]
        scale = 1.0 / jnp.sqrt(fan_in)
        # stored as [in, out] so the reference does x @ W + b (same math as
        # torch.nn.Linear's x @ W^T + b)
        w = jax.random.uniform(kw, (dims[i], dims[i + 1]), jnp.float32,
                               minval=-scale, maxval=scale)
        b = jax.random.uniform(kb, (1, dims[i + 1]), jnp.float32,
                               minval=-scale, maxval=scale)
        params += [w, b]
    return tuple(params)


# ------------------------------ reference ------------------------------------
def _mlp_ref(x, params):
    w0, b0, w1, b1, w2, b2 = params
    a0 = jax.nn.elu(x @ w0 + b0)
    a1 = jax.nn.elu(a0 @ w1 + b1)
    return a1 @ w2 + b2


def hnn_ref(x, params):
    h = _mlp_ref(x, params)
    g = jax.grad(lambda xx: _mlp_ref(xx, params).sum())(x)
    half = x.shape[-1] // 2
    dHdq, dHdp = g[:, :half], g[:, half:]
    return {'xdot_hat': jnp.concatenate([dHdp, -dHdq], axis=-1), 'H_hat': h}


# -------------------------------- main ----------------------------------------
if __name__ == "__main__":
    key = jax.random.PRNGKey(0)
    kx, kp = jax.random.split(key)
    x = jax.random.normal(kx, (BATCH, INPUT_DIM), jnp.float32)
    params = init_params(kp)

    out = hnn_forward(x, params)
    jax.block_until_ready(out)

    ref = hnn_ref(x, params)
    assert jnp.allclose(out['H_hat'], ref['H_hat'], atol=1e-5, rtol=1e-5)
    assert jnp.allclose(out['xdot_hat'], ref['xdot_hat'], atol=1e-5, rtol=1e-5)

    print("KERNEL_OK")
</pallas_src>

<mosaic_0001>
module attributes {stable_mosaic.version = 11 : i64} {
  func.func @hnn_kernel(%arg0: i32, %arg1: memref<4x256xf32, #tpu.memory_space<vmem>>, %arg2: memref<32x4xf32, #tpu.memory_space<vmem>>, %arg3: memref<32x1xf32, #tpu.memory_space<vmem>>, %arg4: memref<32x32xf32, #tpu.memory_space<vmem>>, %arg5: memref<32x1xf32, #tpu.memory_space<vmem>>, %arg6: memref<1x32xf32, #tpu.memory_space<vmem>>, %arg7: memref<32x1xf32, #tpu.memory_space<vmem>>, %arg8: memref<1x1xf32, #tpu.memory_space<vmem>>, %arg9: memref<32x32xf32, #tpu.memory_space<vmem>>, %arg10: memref<4x32xf32, #tpu.memory_space<vmem>>, %arg11: memref<5x256xf32, #tpu.memory_space<vmem>>) attributes {dimension_semantics = [#tpu.dimension_semantics<parallel>], iteration_bounds = array<i64: 1>, scalar_prefetch = 0 : i64, scratch_operands = 0 : i64, tpu.core_type = #tpu.core_type<tc>, window_params = [{transform_indices = @transform_0, window_bounds = array<i64: 4, 256>}, {pipeline_mode = #tpu.pipeline_mode<synchronous>, transform_indices = @transform_1, window_bounds = array<i64: 32, 4>}, {pipeline_mode = #tpu.pipeline_mode<synchronous>, transform_indices = @transform_2, window_bounds = array<i64: 32, 1>}, {pipeline_mode = #tpu.pipeline_mode<synchronous>, transform_indices = @transform_3, window_bounds = array<i64: 32, 32>}, {pipeline_mode = #tpu.pipeline_mode<synchronous>, transform_indices = @transform_4, window_bounds = array<i64: 32, 1>}, {pipeline_mode = #tpu.pipeline_mode<synchronous>, transform_indices = @transform_5, window_bounds = array<i64: 1, 32>}, {pipeline_mode = #tpu.pipeline_mode<synchronous>, transform_indices = @transform_6, window_bounds = array<i64: 32, 1>}, {pipeline_mode = #tpu.pipeline_mode<synchronous>, transform_indices = @transform_7, window_bounds = array<i64: 1, 1>}, {pipeline_mode = #tpu.pipeline_mode<synchronous>, transform_indices = @transform_8, window_bounds = array<i64: 32, 32>}, {pipeline_mode = #tpu.pipeline_mode<synchronous>, transform_indices = @transform_9, window_bounds = array<i64: 4, 32>}, {transform_indices = @transform_10, window_bounds = array<i64: 5, 256>}]} {
    %c0 = arith.constant 0 : index
    %c0_0 = arith.constant 0 : index
    %0 = vector.load %arg1[%c0, %c0_0] : memref<4x256xf32, #tpu.memory_space<vmem>>, vector<4x256xf32>
    %c0_1 = arith.constant 0 : index
    %c0_2 = arith.constant 0 : index
    %1 = vector.load %arg2[%c0_1, %c0_2] : memref<32x4xf32, #tpu.memory_space<vmem>>, vector<32x4xf32>
    %cst = arith.constant dense<0.000000e+00> : vector<32x256xf32>
    %2 = tpu.matmul %1, %0, %cst {dimension_numbers = #tpu.dot_dimension_numbers<[1], [0], [0], [1], [0, 0, 1, 1], [], []>} : vector<32x4xf32>, vector<4x256xf32>, vector<32x256xf32> -> vector<32x256xf32>
    %c0_3 = arith.constant 0 : index
    %c0_4 = arith.constant 0 : index
    %3 = vector.load %arg3[%c0_3, %c0_4] : memref<32x1xf32, #tpu.memory_space<vmem>>, vector<32x1xf32>
    %4 = vector.broadcast %3 : vector<32x1xf32> to vector<32x256xf32>
    %5 = arith.addf %2, %4 : vector<32x256xf32>
    %6 = math.exp %5 : vector<32x256xf32>
    %cst_5 = arith.constant 0.000000e+00 : f32
    %7 = vector.broadcast %cst_5 : f32 to vector<32x256xf32>
    %8 = arith.cmpf ogt, %5, %7 : vector<32x256xf32>
    %cst_6 = arith.constant 1.000000e+00 : f32
    %9 = vector.broadcast %cst_6 : f32 to vector<32x256xf32>
    %10 = arith.subf %6, %9 : vector<32x256xf32>
    %11 = arith.select %8, %5, %10 : vector<32x256xi1>, vector<32x256xf32>
    %c0_7 = arith.constant 0 : index
    %c0_8 = arith.constant 0 : index
    %12 = vector.load %arg4[%c0_7, %c0_8] : memref<32x32xf32, #tpu.memory_space<vmem>>, vector<32x32xf32>
    %cst_9 = arith.constant dense<0.000000e+00> : vector<32x256xf32>
    %13 = tpu.matmul %12, %11, %cst_9 {dimension_numbers = #tpu.dot_dimension_numbers<[1], [0], [0], [1], [0, 0, 1, 1], [], []>} : vector<32x32xf32>, vector<32x256xf32>, vector<32x256xf32> -> vector<32x256xf32>
    %c0_10 = arith.constant 0 : index
    %c0_11 = arith.constant 0 : index
    %14 = vector.load %arg5[%c0_10, %c0_11] : memref<32x1xf32, #tpu.memory_space<vmem>>, vector<32x1xf32>
    %15 = vector.broadcast %14 : vector<32x1xf32> to vector<32x256xf32>
    %16 = arith.addf %13, %15 : vector<32x256xf32>
    %17 = math.exp %16 : vector<32x256xf32>
    %cst_12 = arith.constant 0.000000e+00 : f32
    %18 = vector.broadcast %cst_12 : f32 to vector<32x256xf32>
    %19 = arith.cmpf ogt, %16, %18 : vector<32x256xf32>
    %cst_13 = arith.constant 1.000000e+00 : f32
    %20 = vector.broadcast %cst_13 : f32 to vector<32x256xf32>
    %21 = arith.subf %17, %20 : vector<32x256xf32>
    %22 = arith.select %19, %16, %21 : vector<32x256xi1>, vector<32x256xf32>
    %c0_14 = arith.constant 0 : index
    %c0_15 = arith.constant 0 : index
    %23 = vector.load %arg6[%c0_14, %c0_15] : memref<1x32xf32, #tpu.memory_space<vmem>>, vector<1x32xf32>
    %cst_16 = arith.constant dense<0.000000e+00> : vector<1x256xf32>
    %24 = tpu.matmul %23, %22, %cst_16 {dimension_numbers = #tpu.dot_dimension_numbers<[1], [0], [0], [1], [0, 0, 1, 1], [], []>} : vector<1x32xf32>, vector<32x256xf32>, vector<1x256xf32> -> vector<1x256xf32>
    %c0_17 = arith.constant 0 : index
    %c0_18 = arith.constant 0 : index
    %25 = vector.load %arg8[%c0_17, %c0_18] : memref<1x1xf32, #tpu.memory_space<vmem>>, vector<1x1xf32>
    %26 = vector.broadcast %25 : vector<1x1xf32> to vector<1x256xf32>
    %27 = arith.addf %24, %26 : vector<1x256xf32>
    %cst_19 = arith.constant 0.000000e+00 : f32
    %28 = vector.broadcast %cst_19 : f32 to vector<32x256xf32>
    %29 = arith.cmpf ogt, %16, %28 : vector<32x256xf32>
    %cst_20 = arith.constant 1.000000e+00 : f32
    %30 = vector.broadcast %cst_20 : f32 to vector<32x256xf32>
    %31 = arith.select %29, %30, %17 : vector<32x256xi1>, vector<32x256xf32>
    %c0_21 = arith.constant 0 : index
    %c0_22 = arith.constant 0 : index
    %32 = vector.load %arg7[%c0_21, %c0_22] : memref<32x1xf32, #tpu.memory_space<vmem>>, vector<32x1xf32>
    %33 = vector.broadcast %32 : vector<32x1xf32> to vector<32x256xf32>
    %34 = arith.mulf %33, %31 : vector<32x256xf32>
    %c0_23 = arith.constant 0 : index
    %c0_24 = arith.constant 0 : index
    %35 = vector.load %arg9[%c0_23, %c0_24] : memref<32x32xf32, #tpu.memory_space<vmem>>, vector<32x32xf32>
    %cst_25 = arith.constant dense<0.000000e+00> : vector<32x256xf32>
    %36 = tpu.matmul %35, %34, %cst_25 {dimension_numbers = #tpu.dot_dimension_numbers<[1], [0], [0], [1], [0, 0, 1, 1], [], []>} : vector<32x32xf32>, vector<32x256xf32>, vector<32x256xf32> -> vector<32x256xf32>
    %cst_26 = arith.constant 0.000000e+00 : f32
    %37 = vector.broadcast %cst_26 : f32 to vector<32x256xf32>
    %38 = arith.cmpf ogt, %5, %37 : vector<32x256xf32>
    %cst_27 = arith.constant 1.000000e+00 : f32
    %39 = vector.broadcast %cst_27 : f32 to vector<32x256xf32>
    %40 = arith.select %38, %39, %6 : vector<32x256xi1>, vector<32x256xf32>
    %c0_28 = arith.constant 0 : index
    %c0_29 = arith.constant 0 : index
    %41 = vector.load %arg10[%c0_28, %c0_29] : memref<4x32xf32, #tpu.memory_space<vmem>>, vector<4x32xf32>
    %42 = arith.mulf %36, %40 : vector<32x256xf32>
    %cst_30 = arith.constant dense<0.000000e+00> : vector<4x256xf32>
    %43 = tpu.matmul %41, %42, %cst_30 {dimension_numbers = #tpu.dot_dimension_numbers<[1], [0], [0], [1], [0, 0, 1, 1], [], []>} : vector<4x32xf32>, vector<32x256xf32>, vector<4x256xf32> -> vector<4x256xf32>
    %44 = tpu.concatenate %43, %27 in 0 : vector<4x256xf32>, vector<1x256xf32> -> vector<5x256xf32>
    %c0_31 = arith.constant 0 : index
    %c0_32 = arith.constant 0 : index
    %45 = vector.load %arg11[%c0_31, %c0_32] : memref<5x256xf32, #tpu.memory_space<vmem>>, vector<5x256xf32>
    tpu.vector_store %arg11[%c0_31, %c0_32], %44 {strides = array<i32>} : memref<5x256xf32, #tpu.memory_space<vmem>>, vector<5x256xf32>,
    return
  }
  func.func @transform_0(%arg0: i32) -> (i32, i32) {
    %c0_i32 = arith.constant 0 : i32
    %c0_i32_0 = arith.constant 0 : i32
    return %c0_i32, %arg0 : i32, i32
  }
  func.func @transform_1(%arg0: i32) -> (i32, i32) {
    %c0_i32 = arith.constant 0 : i32
    %c0_i32_0 = arith.constant 0 : i32
    %c0_i32_1 = arith.constant 0 : i32
    return %c0_i32, %c0_i32_0 : i32, i32
  }
  func.func @transform_2(%arg0: i32) -> (i32, i32) {
    %c0_i32 = arith.constant 0 : i32
    %c0_i32_0 = arith.constant 0 : i32
    %c0_i32_1 = arith.constant 0 : i32
    return %c0_i32, %c0_i32_0 : i32, i32
  }
  func.func @transform_3(%arg0: i32) -> (i32, i32) {
    %c0_i32 = arith.constant 0 : i32
    %c0_i32_0 = arith.constant 0 : i32
    %c0_i32_1 = arith.constant 0 : i32
    return %c0_i32, %c0_i32_0 : i32, i32
  }
  func.func @transform_4(%arg0: i32) -> (i32, i32) {
    %c0_i32 = arith.constant 0 : i32
    %c0_i32_0 = arith.constant 0 : i32
    %c0_i32_1 = arith.constant 0 : i32
    return %c0_i32, %c0_i32_0 : i32, i32
  }
  func.func @transform_5(%arg0: i32) -> (i32, i32) {
    %c0_i32 = arith.constant 0 : i32
    %c0_i32_0 = arith.constant 0 : i32
    %c0_i32_1 = arith.constant 0 : i32
    return %c0_i32, %c0_i32_0 : i32, i32
  }
  func.func @transform_6(%arg0: i32) -> (i32, i32) {
    %c0_i32 = arith.constant 0 : i32
    %c0_i32_0 = arith.constant 0 : i32
    %c0_i32_1 = arith.constant 0 : i32
    return %c0_i32, %c0_i32_0 : i32, i32
  }
  func.func @transform_7(%arg0: i32) -> (i32, i32) {
    %c0_i32 = arith.constant 0 : i32
    %c0_i32_0 = arith.constant 0 : i32
    %c0_i32_1 = arith.constant 0 : i32
    return %c0_i32, %c0_i32_0 : i32, i32
  }
  func.func @transform_8(%arg0: i32) -> (i32, i32) {
    %c0_i32 = arith.constant 0 : i32
    %c0_i32_0 = arith.constant 0 : i32
    %c0_i32_1 = arith.constant 0 : i32
    return %c0_i32, %c0_i32_0 : i32, i32
  }
  func.func @transform_9(%arg0: i32) -> (i32, i32) {
    %c0_i32 = arith.constant 0 : i32
    %c0_i32_0 = arith.constant 0 : i32
    %c0_i32_1 = arith.constant 0 : i32
    return %c0_i32, %c0_i32_0 : i32, i32
  }
  func.func @transform_10(%arg0: i32) -> (i32, i32) {
    %c0_i32 = arith.constant 0 : i32
    %c0_i32_0 = arith.constant 0 : i32
    return %c0_i32, %arg0 : i32, i32
  }
}

</mosaic_0001>

<bundles_post_ra>
// kernel: tpu_custom_call.1
= control target key start
LH: loop header
LB: loop body
LE: loop exit
PB: predicated region body
PF: predicated region fallthrough
CT: control target
= control target key end

     0   :  { %s1133_s0 = inlined_call_operand.vmem [shape: f32[4,256], index: 0, kind: input, shape index: {}]   ;;  %s1134_s1 = inlined_call_operand.vmem [shape: f32[32,4], index: 1, kind: input, shape index: {}]   ;;  %s1135_s2 = inlined_call_operand.vmem [shape: f32[32,1], index: 2, kind: input, shape index: {}]   ;;  %s1136_s3 = inlined_call_operand.vmem [shape: f32[32,32], index: 3, kind: input, shape index: {}]   ;;  %s1137_s4 = inlined_call_operand.vmem [shape: f32[32,1], index: 4, kind: input, shape index: {}]   ;;  %s1138_s5 = inlined_call_operand.vmem [shape: f32[1,32], index: 5, kind: input, shape index: {}]   ;;  %s1139_s6 = inlined_call_operand.vmem [shape: f32[32,1], index: 6, kind: input, shape index: {}]   ;;  %s1140_s7 = inlined_call_operand.<no memory space> [shape: f32[1,1], index: 7, kind: input, shape index: {}]   ;;  %s1141_s8 = inlined_call_operand.vmem [shape: f32[32,32], index: 8, kind: input, shape index: {}]   ;;  %s1142_s9 = inlined_call_operand.vmem [shape: f32[4,32], index: 9, kind: input, shape index: {}]   ;;  %s1143_s10 = inlined_call_operand.hbm [shape: f32[5,256], index: 10, kind: output, shape index: {}]  }
   0x1   :  { %v15_v0 = vstv %s1140_s7 }
   0x2   :  { %16 = vst [vmem:[#allocation2] sm:$0x1] %v15_v0 }
   0x3   :  { %v38_v1 = vld [vmem:[%s1133_s0] sm:$0xff]  ;;  %vm82_vm0 = vcmask 1043456   ;;  %v863_v3 = vmov 0.0   ;;  %vm69_vm1 = vcmask 31744   ;;  %v41_v5 = vld [vmem:[%s1134_s1 + $0x10] sm:$0xff]  ;;  %v864_v6 = vmov 0  }
   0x4   :  { %v68_v2 = vcombine.high %v38_v1, %v38_v1  ;;  %151 = vmatprep.mubr.f32.mxu0 %v863_v3  ;;  %163 = vmatprep.mubr.f32.mxu1 %v863_v3  ;;  %v39_v4 = vld [vmem:[%s1134_s1] sm:$0xff]  ;;  %v45_v8 = vld [vmem:[%s1135_s2 + $0x10] sm:$0xff]  ;;  %v40_v9 = vld [vmem:[%s1134_s1 + $0x8] sm:$0xff] }
   0x5   :  { %804 = vset.pattern.permute.xlu0 %v864_v6  ;;  %805 = vset.pattern.permute.xlu1 %v864_v6  ;;  %v43_v7 = vld [vmem:[%s1135_s2] sm:$0xff]  ;;  %v42_v10 = vld [vmem:[%s1134_s1 + $0x18] sm:$0xff] }
   0x6   :  { %731 = vmatprep.subr.msk.mxu0 %vm82_vm0, %v68_v2  ;;  %795 = vmatprep.subr.msk.mxu1 %vm82_vm0, %v68_v2 }
   0x7   :  { %732 = vmatpush1.msk.msra.mxu0 %vm82_vm0, %v38_v1  ;;  %796 = vmatpush1.msk.msra.mxu1 %vm82_vm0, %v38_v1 }
   0x8   :  { %733 = vmatmul.mubr.msk.f32.vlgmr.msra.gmra.mrb[0].mxu0 %vm69_vm1, %v39_v4  ;;  %735 = vmatmul.mubr.msk.f32.vlgmr.msra.gmra.mrb[0].mxu1 %vm69_vm1, %v41_v5 }
   0x9   :  { %157 = vmatprep.mubr.f32.mxu0 %v863_v3  ;;  %169 = vmatprep.mubr.f32.mxu1 %v863_v3 }
   0xa   :  { %17 = vsyncpa [#allocation4], 0  ;;  %49 = vperm.xlu0 %804, %v43_v7   ;;  %59 = vperm.xlu1 %805, %v45_v8   ;;  %v44_v11 = vld [vmem:[%s1135_s2 + $0x8] sm:$0xff]  ;;  %v46_v12 = vld [vmem:[%s1135_s2 + $0x18] sm:$0xff]  ;;  %vm244_vm10 = vcmask 261120   ;;  %s865_s16 = smov [#allocation3]  }
   0xb   :  { %v220_v13 = vld [vmem:[%s1137_s4] sm:$0xff]  ;;  %v221_v14 = vld [vmem:[%s1137_s4 + $0x8] sm:$0xff]  ;;  %v222_v15 = vld [vmem:[%s1137_s4 + $0x10] sm:$0xff]  ;;  %s723_s17 = sshll.u32 %s865_s16, 4  ;;  %s724_s17 = int_to_ptr.vmem [resolvable:$true] %s723_s17 }
   0xc   :  { %734 = vmatmul.mubr.msk.f32.gmra.mrb[2].mxu0 %vm69_vm1, %v40_v9  ;;  %736 = vmatmul.mubr.msk.f32.gmra.mrb[2].mxu1 %vm69_vm1, %v42_v10  ;;  %v223_v16 = vld [vmem:[%s1137_s4 + $0x18] sm:$0xff]  ;;  %v479_v17 = vld [vmem:[%s1139_s6] sm:$0xff]  ;;  %v480_v18 = vld [vmem:[%s1139_s6 + $0x8] sm:$0xff]  ;;  %p844_p1 = scmp.lt.s32.totalorder %s724_s17, %s724_s17 }
   0xd   :  { %321 = vmatprep.mubr.f32.mxu0 %v863_v3  ;;  %333 = vmatprep.mubr.f32.mxu1 %v863_v3  ;;  %v481_v19 = vld [vmem:[%s1139_s6 + $0x10] sm:$0xff]  ;;  %v482_v20 = vld [vmem:[%s1139_s6 + $0x18] sm:$0xff]  ;;  %v387_v21 = vld [vmem:[#allocation2] sm:$0x1] }
   0xe   :  { %54 = vperm.xlu0 %804, %v44_v11   ;;  %64 = vperm.xlu1 %805, %v46_v12  }
  0x12   :  { %226 = vperm.xlu0 %804, %v220_v13   ;;  %231 = vperm.xlu1 %805, %v221_v14  }
  0x16   :  { %236 = vperm.xlu0 %804, %v222_v15   ;;  %241 = vperm.xlu1 %805, %v223_v16  }
  0x1a   :  { %485 = vperm.xlu0 %804, %v479_v17   ;;  %490 = vperm.xlu1 %805, %v480_v18  }
  0x1e   :  { %495 = vperm.xlu0 %804, %v481_v19   ;;  %500 = vperm.xlu1 %805, %v482_v20  }
  0x22   :  { %390 = vperm.xlu0 %804, %v387_v21  }
  0x89   :  { %v50_v22 = vpop.permute.xlu0 %49  ;;  %v60_v23 = vpop.permute.xlu1 %59 }
  0x8d   :  { %v55_v34 = vpop.permute.xlu0 %54  ;;  %v65_v35 = vpop.permute.xlu1 %64 }
  0xdb   :  { %v153_v24 = vpop.f32.mrb[0].mxu0  ;;  %v165_v25 = vpop.f32.mrb[0].mxu1 }
  0xdc   :  { %v154_v26 = vadd.f32 %v153_v24, %v50_v22  ;;  %v166_v27 = vadd.f32 %v165_v25, %v60_v23  ;;  %v155_v28 = vpop.f32.mrb[1].mxu0  ;;  %v167_v29 = vpop.f32.mrb[1].mxu1  ;;  %v218_v24 = vld [vmem:[%s1136_s3 + $0x10] sm:$0xff]  ;;  %v217_v25 = vld [vmem:[%s1136_s3 + $0x8] sm:$0xff] }
  0xdd   :  { %v989_v30 = vadd.f32 %v155_v28, %v50_v22  ;;  %v991_v31 = vadd.f32 %v167_v29, %v60_v23  ;;  %v216_v23 = vld [vmem:[%s1136_s3] sm:$0xff]  ;;  %v232_v28 = vpop.permute.xlu1 %231 }
  0xde   :  { %v176_v32 = vmul.f32 1.442695, %v154_v26  ;;  %v184_v33 = vmul.f32 1.442695, %v166_v27  ;;  %vm192_vm2 = vcmp.gt.f32.partialorder %v154_v26, 0.0  ;;  %vm196_vm3 = vcmp.gt.f32.partialorder %v166_v27, 0.0 }
  0xdf   :  { %v178_v36 = vmul.f32 1.442695, %v989_v30  ;;  %v186_v37 = vmul.f32 1.442695, %v991_v31  ;;  %v159_v38 = vpop.f32.mrb[2].mxu0  ;;  %v171_v39 = vpop.f32.mrb[2].mxu1 }
  0xe0   :  { %807 = vpow2.f32 %v176_v32  ;;  %v160_v40 = vadd.f32 %v159_v38, %v55_v34  ;;  %v172_v41 = vadd.f32 %v171_v39, %v65_v35  ;;  %v161_v42 = vpop.f32.mrb[3].mxu0  ;;  %v173_v43 = vpop.f32.mrb[3].mxu1  ;;  %vm193_vm4 = vcmp.gt.f32.partialorder %v989_v30, 0.0 }
  0xe1   :  { %809 = vpow2.f32 %v184_v33  ;;  %v162_v44 = vadd.f32 %v161_v42, %v55_v34  ;;  %v174_v45 = vadd.f32 %v173_v43, %v65_v35  ;;  %vm197_vm5 = vcmp.gt.f32.partialorder %v991_v31, 0.0 }
  0xe2   :  { %811 = vpow2.f32 %v178_v36  ;;  %v180_v46 = vmul.f32 1.442695, %v160_v40  ;;  %v188_v47 = vmul.f32 1.442695, %v172_v41  ;;  %vm194_vm6 = vcmp.gt.f32.partialorder %v160_v40, 0.0 }
  0xe3   :  { %813 = vpow2.f32 %v186_v37  ;;  %v182_v48 = vmul.f32 1.442695, %v162_v44  ;;  %v190_v49 = vmul.f32 1.442695, %v174_v45  ;;  %vm198_vm7 = vcmp.gt.f32.partialorder %v172_v41, 0.0 }
  0xe4   :  { %815 = vpow2.f32 %v180_v46  ;;  %vm195_vm8 = vcmp.gt.f32.partialorder %v162_v44, 0.0  ;;  %vm199_vm9 = vcmp.gt.f32.partialorder %v174_v45, 0.0 }
  0xe5   :  { %817 = vpow2.f32 %v188_v47 }
  0xe6   :  { %819 = vpow2.f32 %v182_v48 }
  0xe7   :  { %821 = vpow2.f32 %v190_v49 }
  0xea   :  { %v808_v50 = vpop.eup %807 }
  0xeb   :  { %v810_v51 = vpop.eup %809  ;;  %v996_v52 = vsel %vm192_vm2, 1.0, %v808_v50  ;;  %v737_v56 = vadd.f32 -1.0, %v808_v50 }
  0xec   :  { %v812_v53 = vpop.eup %811  ;;  %v1000_v54 = vsel %vm196_vm3, 1.0, %v810_v51  ;;  %v741_v58 = vadd.f32 -1.0, %v810_v51 }
  0xed   :  { %v814_v55 = vpop.eup %813  ;;  %v1005_v57 = vsel %vm193_vm4, 1.0, %v812_v53  ;;  %v738_v63 = vadd.f32 -1.0, %v812_v53  ;;  %v208_v2 = vsel %vm192_vm2, %v154_v26, %v737_v56  ;;  %v219_v26 = vld [vmem:[%s1136_s3 + $0x18] sm:$0xff] }
  0xee   :  { %v1009_v59 = vsel %vm197_vm5, 1.0, %v814_v55  ;;  %v816_v60 = vpop.eup %815  ;;  %v742_v5 = vadd.f32 -1.0, %v814_v55  ;;  %v212_v8 = vsel %vm196_vm3, %v166_v27, %v741_v58  ;;  %v227_v27 = vpop.permute.xlu0 %226 }
  0xef   :  { %v818_v61 = vpop.eup %817  ;;  %v739_v62 = vadd.f32 -1.0, %v816_v60  ;;  %v1011_v0 = vsel %vm194_vm6, 1.0, %v816_v60  ;;  %v209_v17 = vsel %vm193_vm4, %v989_v30, %v738_v63 }
  0xf0   :  { %v820_v1 = vpop.eup %819  ;;  %v743_v4 = vadd.f32 -1.0, %v818_v61  ;;  %v1015_v6 = vsel %vm198_vm7, 1.0, %v818_v61  ;;  %v213_v20 = vsel %vm197_vm5, %v991_v31, %v742_v5 }
  0xf1   :  { %v822_v7 = vpop.eup %821  ;;  %v210_v9 = vsel %vm194_vm6, %v160_v40, %v739_v62  ;;  %v740_v10 = vadd.f32 -1.0, %v820_v1  ;;  %v1019_v11 = vsel %vm195_vm8, 1.0, %v820_v1  ;;  %v242_v40 = vpop.permute.xlu1 %241 }
  0xf2   :  { %v765_v12 = vpack.c.bf16 %v210_v9, %v208_v2  ;;  %v214_v13 = vsel %vm198_vm7, %v172_v41, %v743_v4  ;;  %v744_v14 = vadd.f32 -1.0, %v822_v7  ;;  %v1023_v15 = vsel %vm199_vm9, 1.0, %v822_v7  ;;  %v237_v29 = vpop.permute.xlu0 %236 }
  0xf3   :  { %v769_v16 = vpack.c.bf16 %v214_v13, %v212_v8  ;;  %v211_v18 = vsel %vm195_vm8, %v162_v44, %v740_v10 }
  0xf4   :  { %v763_v19 = vpack.c.bf16 %v211_v18, %v209_v17  ;;  %v215_v21 = vsel %vm199_vm9, %v174_v45, %v744_v14 }
  0xf5   :  { %v767_v22 = vpack.c.bf16 %v215_v21, %v213_v20  ;;  %v491_v62 = vpop.permute.xlu1 %490 }
  0xf6   :  { %764 = vmatprep.subr.bf16.mxu0 %v763_v19  ;;  %797 = vmatprep.subr.bf16.mxu1 %v763_v19  ;;  %v486_v58 = vpop.permute.xlu0 %485 }
  0xf7   :  { %766 = vmatpush1.bf16.msra.mxu0 %v765_v12  ;;  %799 = vmatpush1.bf16.msra.mxu1 %v765_v12 }
  0xf8   :  { %768 = vmatprep.subr.bf16.mxu0 %v767_v22  ;;  %798 = vmatprep.subr.bf16.mxu1 %v767_v22 }
  0xfa   :  { %v496_v10 = vpop.permute.xlu0 %495 }
  0xfb   :  { %770 = vmatpush1.bf16.msra.mxu0 %v769_v16  ;;  %800 = vmatpush1.bf16.msra.mxu1 %v769_v16 }
  0xfe   :  { %745 = vmatmul.mubr.msk.f32.vlgmr.msra.gmra.mrb[4].mxu0 %vm244_vm10, %v216_v23  ;;  %747 = vmatmul.mubr.msk.f32.vlgmr.msra.gmra.mrb[4].mxu1 %vm244_vm10, %v218_v24 }
  0xff   :  { %327 = vmatprep.mubr.f32.mxu0 %v863_v3  ;;  %339 = vmatprep.mubr.f32.mxu1 %v863_v3 }
 0x102   :  { %746 = vmatmul.mubr.msk.f32.gmra.mrb[6].mxu0 %vm244_vm10, %v217_v25  ;;  %748 = vmatmul.mubr.msk.f32.gmra.mrb[6].mxu1 %vm244_vm10, %v219_v26  ;;  %v501_v26 = vpop.permute.xlu1 %500 }
 0x103   :  { %464 = vmatprep.mubr.f32.mxu0 %v863_v3  ;;  %591 = vmatprep.mubr.f32.mxu1 %v863_v3 }
 0x1d1   :  { %v323_v30 = vpop.f32.mrb[4].mxu0  ;;  %v335_v31 = vpop.f32.mrb[4].mxu1 }
 0x1d2   :  { %v324_v32 = vadd.f32 %v323_v30, %v227_v27  ;;  %v336_v33 = vadd.f32 %v335_v31, %v237_v29  ;;  %v325_v34 = vpop.f32.mrb[5].mxu0  ;;  %v337_v35 = vpop.f32.mrb[5].mxu1 }
 0x1d3   :  { %v326_v36 = vadd.f32 %v325_v34, %v227_v27  ;;  %v1053_v37 = vadd.f32 %v337_v35, %v237_v29 }
 0x1d4   :  { %v346_v38 = vmul.f32 1.442695, %v324_v32  ;;  %v354_v39 = vmul.f32 1.442695, %v336_v33  ;;  %vm362_vm11 = vcmp.gt.f32.partialorder %v324_v32, 0.0  ;;  %vm366_vm12 = vcmp.gt.f32.partialorder %v336_v33, 0.0 }
 0x1d5   :  { %v348_v41 = vmul.f32 1.442695, %v326_v36  ;;  %v356_v42 = vmul.f32 1.442695, %v1053_v37  ;;  %v329_v43 = vpop.f32.mrb[6].mxu0  ;;  %v341_v44 = vpop.f32.mrb[6].mxu1 }
 0x1d6   :  { %823 = vpow2.f32 %v346_v38  ;;  %v330_v45 = vadd.f32 %v329_v43, %v232_v28  ;;  %v342_v46 = vadd.f32 %v341_v44, %v242_v40  ;;  %v331_v47 = vpop.f32.mrb[7].mxu0  ;;  %v343_v48 = vpop.f32.mrb[7].mxu1  ;;  %vm363_vm13 = vcmp.gt.f32.partialorder %v326_v36, 0.0 }
 0x1d7   :  { %825 = vpow2.f32 %v354_v39  ;;  %v332_v49 = vadd.f32 %v331_v47, %v232_v28  ;;  %v1056_v50 = vadd.f32 %v343_v48, %v242_v40  ;;  %vm367_vm14 = vcmp.gt.f32.partialorder %v1053_v37, 0.0 }
 0x1d8   :  { %827 = vpow2.f32 %v348_v41  ;;  %v350_v51 = vmul.f32 1.442695, %v330_v45  ;;  %v358_v53 = vmul.f32 1.442695, %v342_v46  ;;  %vm364_vm15 = vcmp.gt.f32.partialorder %v330_v45, 0.0 }
 0x1d9   :  { %829 = vpow2.f32 %v356_v42  ;;  %v352_v55 = vmul.f32 1.442695, %v332_v49  ;;  %v360_v56 = vmul.f32 1.442695, %v1056_v50  ;;  %vm368_vm1 = vcmp.gt.f32.partialorder %v342_v46, 0.0 }
 0x1da   :  { %831 = vpow2.f32 %v350_v51  ;;  %vm365_vm2 = vcmp.gt.f32.partialorder %v332_v49, 0.0  ;;  %vm369_vm3 = vcmp.gt.f32.partialorder %v1056_v50, 0.0 }
 0x1db   :  { %833 = vpow2.f32 %v358_v53 }
 0x1dc   :  { %835 = vpow2.f32 %v352_v55 }
 0x1dd   :  { %837 = vpow2.f32 %v360_v56 }
 0x1e0   :  { %v824_v60 = vpop.eup %823 }
 0x1e1   :  { %v826_v61 = vpop.eup %825  ;;  %v749_v63 = vadd.f32 -1.0, %v824_v60  ;;  %v471_v1 = vsel %vm362_vm11, 1.0, %v824_v60  ;;  %v514_v60 = vld [vmem:[%s1141_s8 + $0x18] sm:$0xff] }
 0x1e2   :  { %v828_v2 = vpop.eup %827  ;;  %v753_v4 = vadd.f32 -1.0, %v826_v61  ;;  %v475_v5 = vsel %vm366_vm12, 1.0, %v826_v61  ;;  %v503_v12 = vmul.f32 %v486_v58, %v471_v1 }
 0x1e3   :  { %v830_v7 = vpop.eup %829  ;;  %v472_v8 = vsel %vm363_vm13, 1.0, %v828_v2  ;;  %v750_v9 = vadd.f32 -1.0, %v828_v2  ;;  %v378_v16 = vsel %vm362_vm11, %v324_v32, %v749_v63  ;;  %v507_v18 = vmul.f32 %v496_v10, %v475_v5 }
 0x1e4   :  { %v476_v13 = vsel %vm367_vm14, 1.0, %v830_v7  ;;  %v832_v14 = vpop.eup %831  ;;  %v382_v17 = vsel %vm366_vm12, %v336_v33, %v753_v4  ;;  %v504_v19 = vmul.f32 %v486_v58, %v472_v8  ;;  %v754_v24 = vadd.f32 -1.0, %v830_v7  ;;  %v513_v58 = vld [vmem:[%s1141_s8 + $0x10] sm:$0xff] }
 0x1e5   :  { %v834_v20 = vpop.eup %833  ;;  %v751_v21 = vadd.f32 -1.0, %v832_v14  ;;  %v473_v22 = vsel %vm364_vm15, 1.0, %v832_v14  ;;  %v379_v23 = vsel %vm363_vm13, %v326_v36, %v750_v9  ;;  %v508_v30 = vmul.f32 %v496_v10, %v476_v13 }
 0x1e6   :  { %v836_v25 = vpop.eup %835  ;;  %v505_v27 = vmul.f32 %v491_v62, %v473_v22  ;;  %v755_v28 = vadd.f32 -1.0, %v834_v20  ;;  %v477_v29 = vsel %vm368_vm1, 1.0, %v834_v20  ;;  %v383_v53 = vsel %vm367_vm14, %v1053_v37, %v754_v24  ;;  %v511_v37 = vld [vmem:[%s1141_s8] sm:$0xff] }
 0x1e7   :  { %v838_v31 = vpop.eup %837  ;;  %v380_v32 = vsel %vm364_vm15, %v330_v45, %v751_v21  ;;  %v509_v33 = vmul.f32 %v501_v26, %v477_v29  ;;  %v474_v34 = vsel %vm365_vm2, 1.0, %v836_v25  ;;  %v752_v35 = vadd.f32 -1.0, %v836_v25  ;;  %v391_v21 = vpop.permute.xlu0 %390 }
 0x1e8   :  { %v773_v38 = vpack.c.bf16 %v380_v32, %v378_v16  ;;  %v384_v39 = vsel %vm368_vm1, %v342_v46, %v755_v28  ;;  %v478_v36 = vsel %vm369_vm3, 1.0, %v838_v31  ;;  %v506_v40 = vmul.f32 %v491_v62, %v474_v34 }
 0x1e9   :  { %v777_v41 = vpack.c.bf16 %v384_v39, %v382_v17  ;;  %v381_v42 = vsel %vm365_vm2, %v332_v49, %v752_v35  ;;  %v781_v43 = vpack.c.bf16 %v505_v27, %v503_v12  ;;  %v756_v44 = vadd.f32 -1.0, %v838_v31  ;;  %v386_v49 = vld [vmem:[%s1138_s5] sm:$0x1] }
 0x1ea   :  { %v771_v47 = vpack.c.bf16 %v381_v42, %v379_v23  ;;  %v779_v48 = vpack.c.bf16 %v506_v40, %v504_v19  ;;  %v510_v51 = vmul.f32 %v501_v26, %v478_v36  ;;  %v785_v45 = vpack.c.bf16 %v509_v33, %v507_v18 }
 0x1eb   :  { %v385_v46 = vsel %vm369_vm3, %v1056_v50, %v756_v44  ;;  %v512_v50 = vld [vmem:[%s1141_s8 + $0x8] sm:$0xff] }
 0x1ec   :  { %772 = vmatprep.subr.bf16.mxu0 %v771_v47  ;;  %780 = vmatprep.subr.bf16.mxu1 %v779_v48  ;;  %v775_v55 = vpack.c.bf16 %v385_v46, %v383_v53  ;;  %v783_v56 = vpack.c.bf16 %v510_v51, %v508_v30 }
 0x1ed   :  { %774 = vmatpush1.bf16.msra.mxu0 %v773_v38  ;;  %782 = vmatpush1.bf16.msra.mxu1 %v781_v43 }
 0x1ee   :  { %776 = vmatprep.subr.bf16.mxu0 %v775_v55  ;;  %784 = vmatprep.subr.bf16.mxu1 %v783_v56 }
 0x1f1   :  { %778 = vmatpush1.bf16.msra.mxu0 %v777_v41  ;;  %786 = vmatpush1.bf16.msra.mxu1 %v785_v45 }
 0x1f4   :  { %757 = vmatmul.mubr.msk.f32.vlgmr.msra.gmra.mrb[8].mxu0 %vm244_vm10, %v386_v49  ;;  %758 = vmatmul.mubr.msk.f32.vlgmr.msra.gmra.mrb[8].mxu1 %vm244_vm10, %v511_v37 }
 0x1f5   :  { %597 = vmatprep.mubr.f32.mxu1 %v863_v3  ;;  %700 = vmatprep.mubr.f32.mxu0 %v863_v3 }
 0x1f8   :  { %759 = vmatmul.mubr.msk.f32.gmra.mrb[10].mxu1 %vm244_vm10, %v512_v50 }
 0x1f9   :  { %603 = vmatprep.mubr.f32.mxu1 %v863_v3 }
 0x1fc   :  { %760 = vmatmul.mubr.msk.f32.gmra.mrb[12].mxu1 %vm244_vm10, %v513_v58 }
 0x1fd   :  { %609 = vmatprep.mubr.f32.mxu1 %v863_v3 }
 0x200   :  { %761 = vmatmul.mubr.msk.f32.gmra.mrb[14].mxu1 %vm244_vm10, %v514_v60 }
 0x2c7   :  { %v466_v61 = vpop.f32.mrb[8].mxu0  ;;  %v593_v62 = vpop.f32.mrb[8].mxu1 }
 0x2c8   :  { %v625_v63 = vmul.f32 %v996_v52, %v593_v62  ;;  %v468_v1 = vpop.f32.mrb[9].mxu0  ;;  %v595_v2 = vpop.f32.mrb[9].mxu1 }
 0x2c9   :  { %v626_v4 = vmul.f32 %v1005_v57, %v595_v2 }
 0x2cb   :  { %v599_v5 = vpop.f32.mrb[10].mxu1 }
 0x2cc   :  { %v627_v7 = vmul.f32 %v1011_v0, %v599_v5  ;;  %v601_v8 = vpop.f32.mrb[11].mxu1 }
 0x2cd   :  { %v628_v3 = vmul.f32 %v1019_v11, %v601_v8  ;;  %v624_v11 = vld [vmem:[%s1142_s9] sm:$0xf]  ;;  %s839_s9 = scalar_lea.vmem %s724_s17, 256 }
 0x2ce   :  { %v789_v9 = vpack.c.bf16 %v627_v7, %v625_v63  ;;  %p840_p0 = scmp.ne.s32.totalorder %s724_s17, %s839_s9  ;;  %p845_p2 = scmp.lt.s32.totalorder %s839_s9, %s839_s9 }
 0x2cf   :  { %v787_v10 = vpack.c.bf16 %v628_v3, %v626_v4  ;;  %v605_v12 = vpop.f32.mrb[12].mxu1 }
 0x2d0   :  { %v629_v13 = vmul.f32 %v1000_v54, %v605_v12  ;;  %v607_v14 = vpop.f32.mrb[13].mxu1  ;;  %v393_v54 = vlaneseq  ;;  %p846_p3 = por %p845_p2, %p844_p1 }
 0x2d1   :  { %v630_v16 = vmul.f32 %v1009_v59, %v607_v14  ;;  %788 = vmatprep.subr.bf16.mxu0 %v787_v10 }
 0x2d2   :  { %790 = vmatpush1.bf16.msra.mxu0 %v789_v9  ;;  %v394_v59 = vshrl.u32 %v393_v54, 7  ;;  %p847_p4 = pnand %p846_p3, %p840_p0 }
 0x2d3   :  { %v611_v52 = vpop.f32.mrb[14].mxu1 }
 0x2d4   :  { %v631_v17 = vmul.f32 %v1015_v6, %v611_v52  ;;  %v613_v57 = vpop.f32.mrb[15].mxu1  ;;  %v395_v20 = vsub.s32 0, %v394_v59 }
 0x2d5   :  { %v632_v18 = vmul.f32 %v1023_v15, %v613_v57 }
 0x2d6   :  { %v793_v0 = vpack.c.bf16 %v631_v17, %v629_v13  ;;  %v396_v22 = vrot.slane %v391_v21, %v395_v20 }
 0x2d7   :  { %v791_v19 = vpack.c.bf16 %v632_v18, %v630_v16 }
 0x2d8   :  { %v467_v23 = vadd.f32 %v466_v61, %v396_v22  ;;  %v469_v6 = vadd.f32 %v468_v1, %v396_v22 }
 0x2d9   :  { %792 = vmatprep.subr.bf16.mxu0 %v791_v19 }
 0x2da   :  { %794 = vmatpush1.bf16.msra.mxu0 %v793_v0  ;;  %v709_v15 = vrot.slane %v467_v23, 4  ;;  %v710_v24 = vrot.slane %v469_v6, 4 }
 0x2dd   :  { %762 = vmatmul.mubr.msk.f32.vlgmr.msra.gmra.mrb[10].mxu0 %vm244_vm10, %v624_v11 }
 0x3b0   :  { %v702_v25 = vpop.f32.mrb[10].mxu0 }
 0x3b1   :  { %v713_v26 = vsel %vm82_vm0, %v702_v25, %v709_v15  ;;  %v704_v27 = vpop.f32.mrb[11].mxu0 }
 0x3b2   :  { %715 = vst [vmem:[#allocation3] sm:$0x1f] %v713_v26  ;;  %v714_v28 = vsel %vm82_vm0, %v704_v27, %v710_v24 }
 0x3b3   :  { %716 = vst [vmem:[#allocation3 + $0x8] sm:$0x1f] %v714_v28 }
 0x3b4   :  { %850 = shalt.err (!%p847_p4)
}
 0x3b5   :  { %s851_s20 = scalar_lea.hbm %s1143_s10, 256 }
 0x3b6   :  { %p852_p5 = scmp.ne.s32.totalorder %s1143_s10, %s851_s20  ;;  %p855_p6 = scmp.lt.u32.totalorder %s851_s20, %s1143_s10 }
 0x3b8   :  { %p857_p7 = pnand %p855_p6, %p852_p5 }
 0x3ba   :  { %860 = shalt.err (!%p857_p7)
}
 0x3bb   :  { %726 = dma.vmem_to_hbm [thread:$0]  %s724_s17, 256, %s1143_s10, [#allocation4]  }
 0x3bc   :  { %861 = dma.done.wait [#allocation4], 256  }
 0x3bd   :  { %862 = vsyncadd [#allocation4], 4294967040 }
 0x3be   :  { %730 = vsyncpa [#allocation4], 1 }

</bundles_post_ra>
